<compile_context>
chip_gen: v7x
topology: tpu7x:2x2x1
jax: 0.10.0
libtpu: 0.0.40
codegen_flags: <defaults>
</compile_context>

<pallas_src>
import numpy as np
import jax
import jax.numpy as jnp
from jax.experimental import pallas as pl
from jax.experimental.pallas import tpu as pltpu

EMBED_DIM = 768          # hard-coded in the PyTorch module
VOCAB_SIZE = 512         # synthetic (module leaves vocab_size = None)
LN_EPS = 1e-5


# ----------------------------------------------------------------------------
# Pallas kernel: LayerNorm (no affine; affine folded into W/bias) + LM head.
# Grid = (row_tiles, vocab_tiles).  LN runs once per row tile (vocab tile 0),
# result cached in bf16 VMEM scratch and reused for all vocab tiles.
# ----------------------------------------------------------------------------
def lm_head_kernel(x_ref, w_ref, b_ref, o_ref, xn_ref):
    @pl.when(pl.program_id(1) == 0)
    def _():
        x = x_ref[...].astype(jnp.float32)                       # (tm, D)
        mean = jnp.mean(x, axis=-1, keepdims=True)
        var = jnp.mean(jnp.square(x - mean), axis=-1, keepdims=True)
        # keep LN math in f32 (v5e has no bf16 VPU); cast only for the MXU.
        xn_ref[...] = ((x - mean) * jax.lax.rsqrt(var + LN_EPS)
                       ).astype(jnp.bfloat16)
    acc = jnp.dot(xn_ref[...], w_ref[...],
                  preferred_element_type=jnp.float32)             # (tm, tn)
    o_ref[...] = acc + b_ref[...]                                 # + folded beta@W


def _pick_tn(V):
    """Lane-dense vocab tile: whole V if it fits, else a large 256-aligned tile."""
    assert V % 128 == 0, V
    if V <= 2048:
        return V
    for tn in (2048, 1024, 512, 256, 128):
        if V % tn == 0:
            return tn
    return 128


def lm_head_pallas(x2d, w_bf16, bias, *, tm):
    """x2d: (Mpad, D) f32, w_bf16: (D, V) bf16 (gamma folded), bias: (1, V) f32."""
    Mpad, D = x2d.shape
    V = w_bf16.shape[1]
    tn = _pick_tn(V)
    assert Mpad % tm == 0 and tm % 16 == 0 and D % 128 == 0 and V % tn == 0
    grid = (Mpad // tm, V // tn)
    flops = 2 * Mpad * D * V
    bytes_accessed = (Mpad * D * 4                      # x (f32), once per row tile
                      + (Mpad // tm) * D * V * 2        # w (bf16), re-streamed per row tile
                      + V * 4                           # bias
                      + Mpad * V * 4)                   # logits out
    return pl.pallas_call(
        lm_head_kernel,
        out_shape=jax.ShapeDtypeStruct((Mpad, V), jnp.float32),
        grid_spec=pltpu.PrefetchScalarGridSpec(
            num_scalar_prefetch=0,
            grid=grid,
            in_specs=[
                pl.BlockSpec((tm, D), lambda i, j: (i, 0)),
                pl.BlockSpec((D, tn), lambda i, j: (0, j)),
                pl.BlockSpec((1, tn), lambda i, j: (0, j)),
            ],
            out_specs=pl.BlockSpec((tm, tn), lambda i, j: (i, j)),
            scratch_shapes=[pltpu.VMEM((tm, D), jnp.bfloat16)],
        ),
        # row axis parallel (shards across the 2 TCs on v7x); vocab axis
        # sequential (innermost) so the LN scratch computed at vocab tile 0 is
        # reused for every vocab tile of the same row tile.
        compiler_params=pltpu.CompilerParams(
            dimension_semantics=("parallel", "arbitrary"),
            vmem_limit_bytes=32 * 1024 * 1024),
        cost_estimate=pl.CostEstimate(flops=flops,
                                      transcendentals=Mpad,
                                      bytes_accessed=bytes_accessed),
    )(x2d, w_bf16, bias)


# jit the whole array path (reshape / pad / pallas_call / slice) so the
# microsecond-scale kernel is not swamped by per-op dispatch.
def _lm_logits_impl(x3d, w_bf16, bias):
    B, L, D = x3d.shape
    V = w_bf16.shape[1]
    M = B * L
    # pad rows to a multiple of 16 (bf16 sublane packing of the LN scratch);
    # for larger inputs tile rows at 256 to keep per-step overhead amortized.
    Mpad = max(16, ((M + 15) // 16) * 16)
    if Mpad > 256:
        Mpad = ((Mpad + 255) // 256) * 256
        tm = 256
    else:
        tm = Mpad
    x2d = x3d.reshape(M, D)
    x2d = jnp.pad(x2d, ((0, Mpad - M), (0, 0)))
    logits = lm_head_pallas(x2d, w_bf16, bias, tm=tm)
    return logits[:M].reshape(B, L, V)


_lm_logits_jit = jax.jit(_lm_logits_impl)


# ----------------------------------------------------------------------------
# Deterministic toy tokenizer (stands in for the HF tokenizer of the module).
# ----------------------------------------------------------------------------
class DummyTokenizer:
    def __init__(self, vocab_size, pad_id=1, bos_id=2):
        self.vocab_size = vocab_size
        self.pad_id = pad_id
        self.bos_id = bos_id

    def encode(self, text):
        return [self.bos_id] + [3 + (ord(c) % (self.vocab_size - 4)) for c in text]

    def __call__(self, texts, max_length=None):
        ids = [self.encode(t) for t in texts]
        if max_length is not None:
            ids = [x[:max_length] for x in ids]
        L = max(len(x) for x in ids)
        arr = np.full((len(ids), L), self.pad_id, dtype=np.int32)
        for i, x in enumerate(ids):
            arr[i, :len(x)] = x
        return arr


# ----------------------------------------------------------------------------
# BaseTextDecoder re-implemented in JAX + Pallas.
# ----------------------------------------------------------------------------
class PallasBaseTextDecoder:
    def __init__(self, text_first=True, num_learnable_prompt_tokens=0,
                 use_start_token_for_caption=False, max_caption_length=128,
                 key=None):
        self.embed_dim = EMBED_DIM
        self.vocab_size = VOCAB_SIZE
        self.tokenizer_uses_end_token = False
        self.ignore_index = 1
        self.added_eos_token = ''
        self.max_caption_length = max_caption_length
        self.text_first = text_first
        self.num_learnable_prompt_tokens = num_learnable_prompt_tokens
        self.use_start_token_for_caption = use_start_token_for_caption
        self.tokenizer = DummyTokenizer(VOCAB_SIZE)

        keys = jax.random.split(key, 6)
        # token embedding table (stands in for llm.model.decoder.embed_tokens)
        self.embed_table = 0.02 * jax.random.normal(
            keys[0], (VOCAB_SIZE, EMBED_DIM), jnp.float32)
        if self.num_learnable_prompt_tokens > 0:
            n = self.num_learnable_prompt_tokens
            self.prefix_prompt_embeds = 0.02 * jax.random.normal(
                keys[1], (n, EMBED_DIM), jnp.float32)
            self.mid_prompt_embeds = 0.02 * jax.random.normal(
                keys[2], (n, EMBED_DIM), jnp.float32)
            self.suffix_prompt_embeds = 0.02 * jax.random.normal(
                keys[3], (n, EMBED_DIM), jnp.float32)
        # TODO(synk): the wrapped self.llm transformer stack is external to this
        # module; it is modeled here as final LayerNorm + LM head.
        self.ln_gamma = jnp.ones((1, EMBED_DIM), jnp.float32)
        self.ln_beta = jnp.zeros((1, EMBED_DIM), jnp.float32)
        self._head_w_f32 = 0.02 * jax.random.normal(
            keys[4], (EMBED_DIM, VOCAB_SIZE), jnp.float32)
        # fold LN affine into the head once at init:
        #   (LN(x)*g + b) @ W  ==  LN_noaffine(x) @ (g*W) + b @ W
        self.head_w_folded = (self.ln_gamma.reshape(-1, 1)
                              * self._head_w_f32).astype(jnp.bfloat16)
        self.head_bias = (self.ln_beta @ self._head_w_f32).astype(jnp.float32)

    # ---- prepare_inputs: mirrors the PyTorch logic -------------------------
    def prepare_inputs(self, text_batch, prompt='', visual_inputs=None,
                       drop_text=False):
        batch_size = len(text_batch)
        if isinstance(prompt, str):
            text_prompts = [prompt for _ in text_batch]
        elif isinstance(prompt, list):
            text_prompts = prompt
        else:
            raise ValueError('prompt input needs to be list or string!')
        text_batch = [t + self.added_eos_token for t in text_batch]

        tokenized_prompts = jnp.asarray(self.tokenizer(text_prompts))
        tokenized_text = jnp.asarray(
            self.tokenizer(text_batch, max_length=self.max_caption_length))

        text_inputs = jnp.take(self.embed_table, tokenized_prompts, axis=0)
        text_targets = jnp.take(self.embed_table, tokenized_text, axis=0)[:, 1:, :]
        if drop_text:
            text_targets = jnp.zeros_like(text_targets)

        start_token = text_inputs[:, 0:1, :]
        text_inputs = text_inputs[:, 1:, :]
        if self.tokenizer_uses_end_token:
            end_token = text_inputs[:, -1:, :]
            text_inputs = text_inputs[:, :-1, :]
        else:
            end_token = jnp.zeros((batch_size, 0, self.embed_dim), jnp.float32)
        if visual_inputs is None:
            visual_inputs = jnp.zeros((batch_size, 0, self.embed_dim), jnp.float32)
        if self.use_start_token_for_caption:
            optional_start_token_for_caption = start_token
        else:
            optional_start_token_for_caption = jnp.zeros(
                (batch_size, 0, self.embed_dim), jnp.float32)

        if self.text_first:
            inputs = [start_token, text_inputs, visual_inputs,
                      optional_start_token_for_caption, text_targets, end_token]
        else:
            inputs = [start_token, visual_inputs, text_inputs,
                      optional_start_token_for_caption, text_targets, end_token]

        if self.num_learnable_prompt_tokens > 0:
            def rep(w):
                return jnp.broadcast_to(w[None, :, :], (batch_size,) + w.shape)
            combined_inputs = jnp.concatenate(
                [inputs[0], rep(self.prefix_prompt_embeds), inputs[1],
                 rep(self.mid_prompt_embeds), inputs[2],
                 rep(self.suffix_prompt_embeds), inputs[3], inputs[4],
                 inputs[5]], axis=1)
        else:
            combined_inputs = jnp.concatenate(inputs, axis=1)
        return combined_inputs

    def _total_num_skip(self, prompt, visual_inputs):
        total_num_skip = 0
        if isinstance(prompt, list):
            total_num_skip += max(len(self.tokenizer.encode(p)) for p in prompt)
        elif isinstance(prompt, str):
            total_num_skip += len(self.tokenizer.encode(prompt))
        else:
            raise ValueError('prompt input needs to be list or string!')
        total_num_skip += self.num_learnable_prompt_tokens * 3
        if visual_inputs is not None:
            total_num_skip += visual_inputs.shape[1]
        if self.use_start_token_for_caption:
            total_num_skip += 1
        if total_num_skip > 0:
            total_num_skip -= 1
        return total_num_skip

    # ---- forward: mirrors `logits[:, total_num_skip:-1, :]` -----------------
    def forward(self, text_batch, prompt=None, visual_inputs=None):
        inputs_embeds = self.prepare_inputs(text_batch, prompt=prompt,
                                            visual_inputs=visual_inputs)
        total_num_skip = self._total_num_skip(prompt, visual_inputs)
        # The synthetic LLM is per-position (LN + head), so slicing off the
        # skipped prompt/visual positions BEFORE the LM head is exact and skips
        # their D x V matmul.  (A real attention LLM would need the full
        # sequence as context; only the logits slice would move.)
        sliced = inputs_embeds[:, total_num_skip:inputs_embeds.shape[1] - 1, :]
        return _lm_logits_jit(sliced, self.head_w_folded, self.head_bias)

    # ---- pure-JAX f32 reference (for tolerance check against bf16 kernel) ---
    def reference_logits(self, text_batch, prompt=None, visual_inputs=None):
        inputs_embeds = self.prepare_inputs(text_batch, prompt=prompt,
                                            visual_inputs=visual_inputs)
        total_num_skip = self._total_num_skip(prompt, visual_inputs)
        x = inputs_embeds[:, total_num_skip:inputs_embeds.shape[1] - 1, :]
        x = x.astype(jnp.float32)
        mean = jnp.mean(x, axis=-1, keepdims=True)
        var = jnp.mean(jnp.square(x - mean), axis=-1, keepdims=True)
        xn = (x - mean) * jax.lax.rsqrt(var + LN_EPS)
        xn = xn * self.ln_gamma[0] + self.ln_beta[0]
        return jnp.einsum('bld,dv->blv', xn, self._head_w_f32)


if __name__ == "__main__":
    key = jax.random.PRNGKey(0)
    kparams, kvis = jax.random.split(key)

    decoder = PallasBaseTextDecoder(text_first=True,
                                    num_learnable_prompt_tokens=2,
                                    use_start_token_for_caption=False,
                                    max_caption_length=8,
                                    key=kparams)

    text_batch = ["a cat", "dog"]
    prompt = "cap"
    visual_inputs = jax.random.normal(kvis, (2, 3, EMBED_DIM), jnp.float32)

    out = decoder.forward(text_batch, prompt=prompt,
                          visual_inputs=visual_inputs)
    out = jax.block_until_ready(out)

    # expected output: (B, T-1, vocab) where T = padded/truncated text length
    T = min(max(len(t) + 1 for t in text_batch), decoder.max_caption_length)
    assert out.shape == (2, T - 1, VOCAB_SIZE), out.shape
    assert out.dtype == jnp.float32
    assert bool(jnp.all(jnp.isfinite(out)))

    # bf16 matmul operands vs f32 reference: loose tolerance check
    ref = decoder.reference_logits(text_batch, prompt=prompt,
                                   visual_inputs=visual_inputs)
    assert np.allclose(np.asarray(out), np.asarray(ref), atol=5e-2, rtol=5e-2)
    print("KERNEL_OK")
</pallas_src>

<mosaic_0001>
module attributes {stable_mosaic.version = 11 : i64} {
  func.func @lm_head_kernel(%arg0: i32, %arg1: i32, %arg2: memref<16x768xf32, #tpu.memory_space<vmem>>, %arg3: memref<768x512xbf16, #tpu.memory_space<vmem>>, %arg4: memref<1x512xf32, #tpu.memory_space<vmem>>, %arg5: memref<16x512xf32, #tpu.memory_space<vmem>>, %arg6: memref<16x768xbf16, #tpu.memory_space<vmem>>) attributes {dimension_semantics = [#tpu.dimension_semantics<parallel>, #tpu.dimension_semantics<arbitrary>], iteration_bounds = array<i64: 1, 1>, scalar_prefetch = 0 : i64, scratch_operands = 1 : i64, tpu.core_type = #tpu.core_type<tc>, window_params = [{transform_indices = @transform_0, window_bounds = array<i64: 16, 768>}, {transform_indices = @transform_1, window_bounds = array<i64: 768, 512>}, {transform_indices = @transform_2, window_bounds = array<i64: 1, 512>}, {transform_indices = @transform_3, window_bounds = array<i64: 16, 512>}]} {
    %c0_i32 = arith.constant 0 : i32
    %0 = arith.cmpi eq, %arg1, %c0_i32 : i32
    %1 = arith.extui %0 : i1 to i32
    %c0_i32_0 = arith.constant 0 : i32
    %2 = arith.cmpi ne, %1, %c0_i32_0 : i32
    scf.if %2 {
      %c0_8 = arith.constant 0 : index
      %c0_9 = arith.constant 0 : index
      %10 = vector.load %arg2[%c0_8, %c0_9] : memref<16x768xf32, #tpu.memory_space<vmem>>, vector<16x768xf32>
      %cst_10 = arith.constant dense<0.000000e+00> : vector<16xf32>
      %11 = vector.multi_reduction <add>, %10, %cst_10 [1] : vector<16x768xf32> to vector<16xf32>
      %12 = vector.shape_cast %11 : vector<16xf32> to vector<16x1xf32>
      %cst_11 = arith.constant 7.680000e+02 : f32
      %13 = vector.broadcast %cst_11 : f32 to vector<16x1xf32>
      %14 = arith.divf %12, %13 : vector<16x1xf32>
      %15 = vector.broadcast %14 : vector<16x1xf32> to vector<16x768xf32>
      %16 = arith.subf %10, %15 : vector<16x768xf32>
      %17 = arith.mulf %16, %16 : vector<16x768xf32>
      %cst_12 = arith.constant dense<0.000000e+00> : vector<16xf32>
      %18 = vector.multi_reduction <add>, %17, %cst_12 [1] : vector<16x768xf32> to vector<16xf32>
      %19 = vector.shape_cast %18 : vector<16xf32> to vector<16x1xf32>
      %cst_13 = arith.constant 7.680000e+02 : f32
      %20 = vector.broadcast %cst_13 : f32 to vector<16x1xf32>
      %21 = arith.divf %19, %20 : vector<16x1xf32>
      %22 = vector.broadcast %14 : vector<16x1xf32> to vector<16x768xf32>
      %23 = arith.subf %10, %22 : vector<16x768xf32>
      %cst_14 = arith.constant 9.99999974E-6 : f32
      %24 = vector.broadcast %cst_14 : f32 to vector<16x1xf32>
      %25 = arith.addf %21, %24 : vector<16x1xf32>
      %26 = math.rsqrt %25 : vector<16x1xf32>
      %27 = vector.broadcast %26 : vector<16x1xf32> to vector<16x768xf32>
      %28 = arith.mulf %23, %27 : vector<16x768xf32>
      %29 = arith.truncf %28 : vector<16x768xf32> to vector<16x768xbf16>
      %c0_15 = arith.constant 0 : index
      %c0_16 = arith.constant 0 : index
      %30 = vector.load %arg6[%c0_15, %c0_16] : memref<16x768xbf16, #tpu.memory_space<vmem>>, vector<16x768xbf16>
      tpu.vector_store %arg6[%c0_15, %c0_16], %29 {strides = array<i32>} : memref<16x768xbf16, #tpu.memory_space<vmem>>, vector<16x768xbf16>,
    } else {
    }
    %c0 = arith.constant 0 : index
    %c0_1 = arith.constant 0 : index
    %3 = vector.load %arg6[%c0, %c0_1] : memref<16x768xbf16, #tpu.memory_space<vmem>>, vector<16x768xbf16>
    %c0_2 = arith.constant 0 : index
    %c0_3 = arith.constant 0 : index
    %4 = vector.load %arg3[%c0_2, %c0_3] : memref<768x512xbf16, #tpu.memory_space<vmem>>, vector<768x512xbf16>
    %cst = arith.constant dense<0.000000e+00> : vector<16x512xf32>
    %5 = tpu.matmul %3, %4, %cst {dimension_numbers = #tpu.dot_dimension_numbers<[1], [0], [0], [1], [0, 0, 1, 1], [], []>} : vector<16x768xbf16>, vector<768x512xbf16>, vector<16x512xf32> -> vector<16x512xf32>
    %c0_4 = arith.constant 0 : index
    %c0_5 = arith.constant 0 : index
    %6 = vector.load %arg4[%c0_4, %c0_5] : memref<1x512xf32, #tpu.memory_space<vmem>>, vector<1x512xf32>
    %7 = vector.broadcast %6 : vector<1x512xf32> to vector<16x512xf32>
    %8 = arith.addf %5, %7 : vector<16x512xf32>
    %c0_6 = arith.constant 0 : index
    %c0_7 = arith.constant 0 : index
    %9 = vector.load %arg5[%c0_6, %c0_7] : memref<16x512xf32, #tpu.memory_space<vmem>>, vector<16x512xf32>
    tpu.vector_store %arg5[%c0_6, %c0_7], %8 {strides = array<i32>} : memref<16x512xf32, #tpu.memory_space<vmem>>, vector<16x512xf32>,
    return
  }
  func.func @transform_0(%arg0: i32, %arg1: i32) -> (i32, i32) {
    %c0_i32 = arith.constant 0 : i32
    %c0_i32_0 = arith.constant 0 : i32
    return %arg0, %c0_i32 : i32, i32
  }
  func.func @transform_1(%arg0: i32, %arg1: i32) -> (i32, i32) {
    %c0_i32 = arith.constant 0 : i32
    %c0_i32_0 = arith.constant 0 : i32
    return %c0_i32, %arg1 : i32, i32
  }
  func.func @transform_2(%arg0: i32, %arg1: i32) -> (i32, i32) {
    %c0_i32 = arith.constant 0 : i32
    %c0_i32_0 = arith.constant 0 : i32
    return %c0_i32, %arg1 : i32, i32
  }
  func.func @transform_3(%arg0: i32, %arg1: i32) -> (i32, i32) {
    %c0_i32 = arith.constant 0 : i32
    return %arg0, %arg1 : i32, i32
  }
}

</mosaic_0001>

<bundles_post_ra>
// kernel: _lm_logits_impl.1
= control target key start
LH: loop header
LB: loop body
LE: loop exit
PB: predicated region body
PF: predicated region fallthrough
CT: control target
= control target key end

     0   :  { %8 = vsyncpa [#allocation4], 0  ;;  %s2115_s12 = smov [#allocation3]   ;;  %s2333_s0 = inlined_call_operand.vmem [shape: f32[16,768], index: 0, kind: input, shape index: {}]   ;;  %s2334_s1 = inlined_call_operand.hbm [shape: bf16[768,512], index: 1, kind: input, shape index: {}]   ;;  %s2335_s2 = inlined_call_operand.vmem [shape: f32[1,512], index: 2, kind: input, shape index: {}]   ;;  %s2336_s3 = inlined_call_operand.vmem [shape: f32[16,512], index: 3, kind: output, shape index: {}]  }
   0x1   :  { %s16_s13 = sshll.u32 %s2115_s12, 4  ;;  %s2091_s16 = scalar_lea.hbm %s2334_s1, 24576  ;;  %s17_s13 = int_to_ptr.vmem [resolvable:$true] %s16_s13 }
   0x2   :  { %p2092_p0 = scmp.ne.s32.totalorder %s2334_s1, %s2091_s16  ;;  %p2095_p1 = scmp.lt.u32.totalorder %s2091_s16, %s2334_s1 }
   0x4   :  { %p2097_p2 = pnand %p2095_p1, %p2092_p0 }
   0x6   :  { %2100 = shalt.err (!%p2097_p2)
}
   0x7   :  { %s2101_s21 = scalar_lea.vmem %s17_s13, 24576  ;;  %p2106_p4 = scmp.lt.s32.totalorder %s17_s13, %s17_s13 }
   0x8   :  { %p2102_p3 = scmp.ne.s32.totalorder %s17_s13, %s2101_s21  ;;  %p2107_p5 = scmp.lt.s32.totalorder %s2101_s21, %s2101_s21 }
   0xa   :  { %p2108_p6 = por %p2107_p5, %p2106_p4 }
   0xc   :  { %p2109_p7 = pnand %p2108_p6, %p2102_p3 }
   0xe   :  { %2112 = shalt.err (!%p2109_p7)
}
   0xf   :  { %s2116_s22 = smov 256   ;;  %s2117_s23 = smov 16  }
  0x10   :  { %22 = dma.hbm_to_vmem [thread:$0]  %s2334_s1, 24576, %s17_s13, [#allocation4], %s2116_s22, %s2116_s22, %s2117_s23  }
  0x11   :  { %2113 = dma.done.wait [#allocation4], 24576  }
  0x12   :  { %2114 = vsyncadd [#allocation4], 4294942720  ;;  %v2153_v0 = vld [vmem:[%s2333_s0] sm:$0xff]  ;;  %v2158_v1 = vld [vmem:[%s2333_s0 + $0x8] sm:$0xff] }
  0x13   :  { %v2163_v2 = vld [vmem:[%s2333_s0 + $0x10] sm:$0xff]  ;;  %v2168_v3 = vld [vmem:[%s2333_s0 + $0x18] sm:$0xff]  ;;  %v44_v4 = vadd.f32 %v2158_v1, %v2153_v0  ;;  %v2185_v7 = vld [vmem:[%s2333_s0 + $0x40] sm:$0xff] }
  0x14   :  { %v2175_v5 = vld [vmem:[%s2333_s0 + $0x30] sm:$0xff]  ;;  %v2180_v6 = vld [vmem:[%s2333_s0 + $0x38] sm:$0xff]  ;;  %v2190_v8 = vld [vmem:[%s2333_s0 + $0x20] sm:$0xff] }
  0x15   :  { %v45_v9 = vadd.f32 %v44_v4, %v2163_v2  ;;  %v2196_v10 = vld [vmem:[%s2333_s0 + $0x48] sm:$0xff]  ;;  %v51_v11 = vadd.f32 %v2180_v6, %v2175_v5  ;;  %v2208_v13 = vld [vmem:[%s2333_s0 + $0x50] sm:$0xff]  ;;  %v2215_v16 = vld [vmem:[%s2333_s0 + $0x58] sm:$0xff] }
  0x16   :  { %v2203_v12 = vld [vmem:[%s2333_s0 + $0x28] sm:$0xff]  ;;  %v1799_v22 = vld [vmem:[#allocation3 + $0x4] ss:$16 sps:$4 sm:$0xff]   ;;  %v1803_v24 = vld [vmem:[#allocation3] ss:$16 sps:$4 sm:$0xff]  }
  0x17   :  { %v46_v14 = vadd.f32 %v45_v9, %v2168_v3  ;;  %v52_v15 = vadd.f32 %v51_v11, %v2185_v7  ;;  %v1801_v23 = vld [vmem:[#allocation3 + $0xc] ss:$16 sps:$4 sm:$0xff]   ;;  %v1804_v25 = vld [vmem:[#allocation3 + $0x8] ss:$16 sps:$4 sm:$0xff]   ;;  %v1805_v26 = vld [vmem:[#allocation3 + $0x24] ss:$16 sps:$4 sm:$0xff]   ;;  %1309 = vmatprep.subr.bf16.mxu0 %v1799_v22 }
  0x18   :  { %v1807_v27 = vld [vmem:[#allocation3 + $0x2c] ss:$16 sps:$4 sm:$0xff]   ;;  %1438 = vmatprep.subr.bf16.mxu1 %v1801_v23  ;;  %1310 = vmatpush1.bf16.msra.mxu0 %v1803_v24  ;;  %v1809_v28 = vld [vmem:[#allocation3 + $0x20] ss:$16 sps:$4 sm:$0xff]   ;;  %v1810_v29 = vld [vmem:[#allocation3 + $0x28] ss:$16 sps:$4 sm:$0xff]  }
  0x19   :  { %v47_v17 = vadd.f32 %v46_v14, %v2190_v8  ;;  %v53_v18 = vadd.f32 %v52_v15, %v2196_v10  ;;  %1439 = vmatpush1.bf16.msra.mxu1 %v1804_v25  ;;  %1311 = vmatprep.subr.bf16.mxu0 %v1805_v26  ;;  %v1811_v30 = vld [vmem:[#allocation3 + $0x44] ss:$16 sps:$4 sm:$0xff]   ;;  %v1813_v31 = vld [vmem:[#allocation3 + $0x4c] ss:$16 sps:$4 sm:$0xff]   ;;  %v1815_v32 = vld [vmem:[#allocation3 + $0x40] ss:$16 sps:$4 sm:$0xff]  }
  0x1a   :  { %1440 = vmatprep.subr.bf16.mxu1 %v1807_v27  ;;  %v1816_v33 = vld [vmem:[#allocation3 + $0x48] ss:$16 sps:$4 sm:$0xff]   ;;  %v1817_v34 = vld [vmem:[#allocation3 + $0x64] ss:$16 sps:$4 sm:$0xff]   ;;  %v1819_v35 = vld [vmem:[#allocation3 + $0x6c] ss:$16 sps:$4 sm:$0xff]  }
  0x1b   :  { %v48_v19 = vadd.f32 %v47_v17, %v2203_v12  ;;  %v54_v20 = vadd.f32 %v53_v18, %v2208_v13  ;;  %v1821_v36 = vld [vmem:[#allocation3 + $0x60] ss:$16 sps:$4 sm:$0xff]   ;;  %v1822_v37 = vld [vmem:[#allocation3 + $0x68] ss:$16 sps:$4 sm:$0xff]   ;;  %v1823_v38 = vld [vmem:[#allocation3 + $0x84] ss:$16 sps:$4 sm:$0xff]  }
  0x1c   :  { %1312 = vmatpush1.bf16.msra.mxu0 %v1809_v28  ;;  %v1825_v39 = vld [vmem:[#allocation3 + $0x8c] ss:$16 sps:$4 sm:$0xff]   ;;  %v1827_v40 = vld [vmem:[#allocation3 + $0x80] ss:$16 sps:$4 sm:$0xff]   ;;  %v1828_v41 = vld [vmem:[#allocation3 + $0x88] ss:$16 sps:$4 sm:$0xff]  }
  0x1d   :  { %49 = vadd.xlane.f32.xlu0 %v48_v19  ;;  %v55_v21 = vadd.f32 %v54_v20, %v2215_v16  ;;  %1441 = vmatpush1.bf16.msra.mxu1 %v1810_v29  ;;  %v1829_v42 = vld [vmem:[#allocation3 + $0xa4] ss:$16 sps:$4 sm:$0xff]   ;;  %v1831_v43 = vld [vmem:[#allocation3 + $0xac] ss:$16 sps:$4 sm:$0xff]   ;;  %v1833_v44 = vld [vmem:[#allocation3 + $0xa0] ss:$16 sps:$4 sm:$0xff]  }
  0x1e   :  { %1313 = vmatprep.subr.bf16.mxu0 %v1811_v30  ;;  %1442 = vmatprep.subr.bf16.mxu1 %v1813_v31  ;;  %v1834_v45 = vld [vmem:[#allocation3 + $0xa8] ss:$16 sps:$4 sm:$0xff]   ;;  %v1835_v46 = vld [vmem:[#allocation3 + $0xc4] ss:$16 sps:$4 sm:$0xff]   ;;  %v1837_v47 = vld [vmem:[#allocation3 + $0xcc] ss:$16 sps:$4 sm:$0xff]  }
  0x1f   :  { %v1839_v48 = vld [vmem:[#allocation3 + $0xc0] ss:$16 sps:$4 sm:$0xff]   ;;  %v1840_v49 = vld [vmem:[#allocation3 + $0xc8] ss:$16 sps:$4 sm:$0xff]   ;;  %v1841_v50 = vld [vmem:[#allocation3 + $0xe4] ss:$16 sps:$4 sm:$0xff]  }
  0x20   :  { %1314 = vmatpush1.bf16.msra.mxu0 %v1815_v32  ;;  %v1843_v51 = vld [vmem:[#allocation3 + $0xec] ss:$16 sps:$4 sm:$0xff]   ;;  %v1845_v52 = vld [vmem:[#allocation3 + $0xe0] ss:$16 sps:$4 sm:$0xff]   ;;  %v1846_v53 = vld [vmem:[#allocation3 + $0xe8] ss:$16 sps:$4 sm:$0xff]  }
  0x21   :  { %56 = vadd.xlane.f32.xlu0 %v55_v21  ;;  %1443 = vmatpush1.bf16.msra.mxu1 %v1816_v33  ;;  %v1847_v54 = vld [vmem:[#allocation3 + $0x104] ss:$16 sps:$4 sm:$0xff]   ;;  %v1849_v55 = vld [vmem:[#allocation3 + $0x10c] ss:$16 sps:$4 sm:$0xff]   ;;  %v1851_v56 = vld [vmem:[#allocation3 + $0x100] ss:$16 sps:$4 sm:$0xff]  }
  0x22   :  { %1315 = vmatprep.subr.bf16.mxu0 %v1817_v34  ;;  %1444 = vmatprep.subr.bf16.mxu1 %v1819_v35  ;;  %v1852_v57 = vld [vmem:[#allocation3 + $0x108] ss:$16 sps:$4 sm:$0xff]   ;;  %v1853_v58 = vld [vmem:[#allocation3 + $0x124] ss:$16 sps:$4 sm:$0xff]   ;;  %v1855_v59 = vld [vmem:[#allocation3 + $0x12c] ss:$16 sps:$4 sm:$0xff]  }
  0x23   :  { %v1857_v60 = vld [vmem:[#allocation3 + $0x120] ss:$16 sps:$4 sm:$0xff]   ;;  %v1858_v61 = vld [vmem:[#allocation3 + $0x128] ss:$16 sps:$4 sm:$0xff]   ;;  %v1859_v62 = vld [vmem:[#allocation3 + $0x144] ss:$16 sps:$4 sm:$0xff]  }
  0x24   :  { %1316 = vmatpush1.bf16.msra.mxu0 %v1821_v36  ;;  %v1861_v63 = vld [vmem:[#allocation3 + $0x14c] ss:$16 sps:$4 sm:$0xff]  }
  0x25   :  { %1445 = vmatpush1.bf16.msra.mxu1 %v1822_v37  ;;  %1317 = vmatprep.subr.bf16.mxu0 %v1823_v38 }
  0x26   :  { %1446 = vmatprep.subr.bf16.mxu1 %v1825_v39  ;;  %v1863_v39 = vld [vmem:[#allocation3 + $0x140] ss:$16 sps:$4 sm:$0xff]  }
  0x28   :  { %1318 = vmatpush1.bf16.msra.mxu0 %v1827_v40  ;;  %v1864_v40 = vld [vmem:[#allocation3 + $0x148] ss:$16 sps:$4 sm:$0xff]  }
  0x29   :  { %1447 = vmatpush1.bf16.msra.mxu1 %v1828_v41  ;;  %1319 = vmatprep.subr.bf16.mxu0 %v1829_v42  ;;  %v1867_v41 = vld [vmem:[#allocation3 + $0x16c] ss:$16 sps:$4 sm:$0xff]   ;;  %v1869_v42 = vld [vmem:[#allocation3 + $0x160] ss:$16 sps:$4 sm:$0xff]  }
  0x2a   :  { %1448 = vmatprep.subr.bf16.mxu1 %v1831_v43  ;;  %v1870_v43 = vld [vmem:[#allocation3 + $0x168] ss:$16 sps:$4 sm:$0xff]  }
  0x2c   :  { %1320 = vmatpush1.bf16.msra.mxu0 %v1833_v44  ;;  %v1871_v44 = vld [vmem:[#allocation3 + $0x184] ss:$16 sps:$4 sm:$0xff]  }
  0x2d   :  { %1449 = vmatpush1.bf16.msra.mxu1 %v1834_v45  ;;  %1321 = vmatprep.subr.bf16.mxu0 %v1835_v46  ;;  %v1873_v45 = vld [vmem:[#allocation3 + $0x18c] ss:$16 sps:$4 sm:$0xff]   ;;  %v1875_v46 = vld [vmem:[#allocation3 + $0x180] ss:$16 sps:$4 sm:$0xff]  }
  0x2e   :  { %1450 = vmatprep.subr.bf16.mxu1 %v1837_v47  ;;  %v1876_v47 = vld [vmem:[#allocation3 + $0x188] ss:$16 sps:$4 sm:$0xff]  }
  0x30   :  { %1322 = vmatpush1.bf16.msra.mxu0 %v1839_v48  ;;  %v1877_v48 = vld [vmem:[#allocation3 + $0x1a4] ss:$16 sps:$4 sm:$0xff]  }
  0x31   :  { %1451 = vmatpush1.bf16.msra.mxu1 %v1840_v49  ;;  %1323 = vmatprep.subr.bf16.mxu0 %v1841_v50  ;;  %v1879_v49 = vld [vmem:[#allocation3 + $0x1ac] ss:$16 sps:$4 sm:$0xff]   ;;  %v1881_v50 = vld [vmem:[#allocation3 + $0x1a0] ss:$16 sps:$4 sm:$0xff]  }
  0x32   :  { %1452 = vmatprep.subr.bf16.mxu1 %v1843_v51  ;;  %v1882_v51 = vld [vmem:[#allocation3 + $0x1a8] ss:$16 sps:$4 sm:$0xff]  }
  0x34   :  { %1324 = vmatpush1.bf16.msra.mxu0 %v1845_v52  ;;  %v1883_v52 = vld [vmem:[#allocation3 + $0x1c4] ss:$16 sps:$4 sm:$0xff]  }
  0x35   :  { %1453 = vmatpush1.bf16.msra.mxu1 %v1846_v53  ;;  %1325 = vmatprep.subr.bf16.mxu0 %v1847_v54  ;;  %v1885_v53 = vld [vmem:[#allocation3 + $0x1cc] ss:$16 sps:$4 sm:$0xff]   ;;  %v1887_v54 = vld [vmem:[#allocation3 + $0x1c0] ss:$16 sps:$4 sm:$0xff]  }
  0x36   :  { %1454 = vmatprep.subr.bf16.mxu1 %v1849_v55  ;;  %v1888_v55 = vld [vmem:[#allocation3 + $0x1c8] ss:$16 sps:$4 sm:$0xff]  }
  0x38   :  { %1326 = vmatpush1.bf16.msra.mxu0 %v1851_v56  ;;  %v1889_v56 = vld [vmem:[#allocation3 + $0x1e4] ss:$16 sps:$4 sm:$0xff]  }
  0x39   :  { %1455 = vmatpush1.bf16.msra.mxu1 %v1852_v57  ;;  %1327 = vmatprep.subr.bf16.mxu0 %v1853_v58  ;;  %v1891_v57 = vld [vmem:[#allocation3 + $0x1ec] ss:$16 sps:$4 sm:$0xff]   ;;  %v1893_v58 = vld [vmem:[#allocation3 + $0x1e0] ss:$16 sps:$4 sm:$0xff]  }
  0x3a   :  { %1456 = vmatprep.subr.bf16.mxu1 %v1855_v59  ;;  %v1894_v59 = vld [vmem:[#allocation3 + $0x1e8] ss:$16 sps:$4 sm:$0xff]  }
  0x3c   :  { %1328 = vmatpush1.bf16.msra.mxu0 %v1857_v60  ;;  %v1897_v60 = vld [vmem:[#allocation3 + $0x204] ss:$16 sps:$4 sm:$0xff]  }
  0x3d   :  { %1457 = vmatpush1.bf16.msra.mxu1 %v1858_v61  ;;  %1329 = vmatprep.subr.bf16.mxu0 %v1859_v62  ;;  %v1900_v61 = vld [vmem:[#allocation3 + $0x20c] ss:$16 sps:$4 sm:$0xff]  }
  0x3e   :  { %1458 = vmatprep.subr.bf16.mxu1 %v1861_v63 }
  0x40   :  { %1330 = vmatpush1.bf16.msra.mxu0 %v1863_v39  ;;  %v1921_v39 = vld [vmem:[#allocation3 + $0x284] ss:$16 sps:$4 sm:$0xff]  }
  0x41   :  { %1459 = vmatpush1.bf16.msra.mxu1 %v1864_v40  ;;  %v1924_v40 = vld [vmem:[#allocation3 + $0x28c] ss:$16 sps:$4 sm:$0xff]  }
  0x42   :  { %1460 = vmatprep.subr.bf16.mxu1 %v1867_v41  ;;  %v1922_v41 = vld [vmem:[#allocation3 + $0x288] ss:$16 sps:$4 sm:$0xff]  }
  0x45   :  { %1461 = vmatpush1.bf16.msra.mxu1 %v1870_v43  ;;  %v1930_v43 = vld [vmem:[#allocation3 + $0x2ac] ss:$16 sps:$4 sm:$0xff]  }
  0x46   :  { %1462 = vmatprep.subr.bf16.mxu1 %v1873_v45  ;;  %v1928_v45 = vld [vmem:[#allocation3 + $0x2a8] ss:$16 sps:$4 sm:$0xff]  }
  0x49   :  { %1463 = vmatpush1.bf16.msra.mxu1 %v1876_v47  ;;  %v1936_v47 = vld [vmem:[#allocation3 + $0x2cc] ss:$16 sps:$4 sm:$0xff]  }
  0x4a   :  { %1464 = vmatprep.subr.bf16.mxu1 %v1879_v49  ;;  %v1934_v49 = vld [vmem:[#allocation3 + $0x2c8] ss:$16 sps:$4 sm:$0xff]  }
  0x4d   :  { %1465 = vmatpush1.bf16.msra.mxu1 %v1882_v51  ;;  %v1942_v51 = vld [vmem:[#allocation3 + $0x2ec] ss:$16 sps:$4 sm:$0xff]  }
  0x4e   :  { %1466 = vmatprep.subr.bf16.mxu1 %v1885_v53  ;;  %v1940_v53 = vld [vmem:[#allocation3 + $0x2e8] ss:$16 sps:$4 sm:$0xff]  }
  0x51   :  { %1467 = vmatpush1.bf16.msra.mxu1 %v1888_v55  ;;  %v1948_v55 = vld [vmem:[#allocation3 + $0x30c] ss:$16 sps:$4 sm:$0xff]  }
  0x52   :  { %1468 = vmatprep.subr.bf16.mxu1 %v1891_v57  ;;  %v1946_v57 = vld [vmem:[#allocation3 + $0x308] ss:$16 sps:$4 sm:$0xff]  }
  0x55   :  { %1469 = vmatpush1.bf16.msra.mxu1 %v1894_v59  ;;  %v1954_v59 = vld [vmem:[#allocation3 + $0x32c] ss:$16 sps:$4 sm:$0xff]  }
  0x56   :  { %1481 = vmatprep.subr.bf16.mxu1 %v1900_v61  ;;  %v1952_v61 = vld [vmem:[#allocation3 + $0x328] ss:$16 sps:$4 sm:$0xff]  }
  0xaa   :  { %v50_v4 = vpop.xlane.xlu0 %49 }
  0xab   :  { %v59_v9 = vmul.f32 0.0013020834, %v50_v4 }
  0xad   :  { %v2223_v11 = vsub.f32 %v2153_v0, %v59_v9  ;;  %v2226_v14 = vsub.f32 %v2158_v1, %v59_v9  ;;  %v2229_v15 = vsub.f32 %v2163_v2, %v59_v9  ;;  %v2232_v18 = vsub.f32 %v2168_v3, %v59_v9 }
  0xae   :  { %v57_v17 = vpop.xlane.xlu0 %56  ;;  %v2239_v0 = vsub.f32 %v2190_v8, %v59_v9  ;;  %v2253_v24 = vsub.f32 %v2203_v12, %v59_v9 }
  0xaf   :  { %v60_v19 = vmul.f32 0.0013020834, %v57_v17  ;;  %v73_v20 = vmul.f32 %v2223_v11, %v2223_v11  ;;  %v74_v21 = vmul.f32 %v2226_v14, %v2226_v14  ;;  %v75_v1 = vmul.f32 %v2229_v15, %v2229_v15 }
  0xb0   :  { %v76_v8 = vmul.f32 %v2232_v18, %v2232_v18 }
  0xb1   :  { %v85_v22 = vadd.f32 %v74_v21, %v73_v20  ;;  %v2244_v2 = vsub.f32 %v2175_v5, %v60_v19  ;;  %v2247_v3 = vsub.f32 %v2180_v6, %v60_v19  ;;  %v2250_v23 = vsub.f32 %v2185_v7, %v60_v19 }
  0xb2   :  { %v2258_v26 = vsub.f32 %v2196_v10, %v60_v19  ;;  %v77_v7 = vmul.f32 %v2239_v0, %v2239_v0  ;;  %v2267_v12 = vsub.f32 %v2208_v13, %v60_v19  ;;  %v78_v10 = vmul.f32 %v2253_v24, %v2253_v24 }
  0xb3   :  { %v86_v25 = vadd.f32 %v85_v22, %v75_v1  ;;  %v79_v5 = vmul.f32 %v2244_v2, %v2244_v2  ;;  %v80_v6 = vmul.f32 %v2247_v3, %v2247_v3  ;;  %v81_v28 = vmul.f32 %v2250_v23, %v2250_v23 }
  0xb4   :  { %v2274_v31 = vsub.f32 %v2215_v16, %v60_v19  ;;  %v82_v32 = vmul.f32 %v2258_v26, %v2258_v26  ;;  %v83_v13 = vmul.f32 %v2267_v12, %v2267_v12  ;;  %v1865_v16 = vld [vmem:[#allocation3 + $0x164] ss:$16 sps:$4 sm:$0xff]  }
  0xb5   :  { %v87_v27 = vadd.f32 %v86_v25, %v76_v8  ;;  %v92_v29 = vadd.f32 %v80_v6, %v79_v5  ;;  %1331 = vmatprep.subr.bf16.mxu0 %v1865_v16  ;;  %v1919_v16 = vld [vmem:[#allocation3 + $0x280] ss:$16 sps:$4 sm:$0xff]  }
  0xb6   :  { %v84_v36 = vmul.f32 %v2274_v31, %v2274_v31  ;;  %1332 = vmatpush1.bf16.msra.mxu0 %v1869_v42  ;;  %v1927_v42 = vld [vmem:[#allocation3 + $0x2a4] ss:$16 sps:$4 sm:$0xff]  }
  0xb7   :  { %v88_v30 = vadd.f32 %v87_v27, %v77_v7  ;;  %v93_v33 = vadd.f32 %v92_v29, %v81_v28  ;;  %1333 = vmatprep.subr.bf16.mxu0 %v1871_v44  ;;  %v1925_v44 = vld [vmem:[#allocation3 + $0x2a0] ss:$16 sps:$4 sm:$0xff]  }
  0xb9   :  { %v89_v34 = vadd.f32 %v88_v30, %v78_v10  ;;  %v94_v35 = vadd.f32 %v93_v33, %v82_v32  ;;  %v1898_v30 = vld [vmem:[#allocation3 + $0x208] ss:$16 sps:$4 sm:$0xff]   ;;  %v1909_v33 = vld [vmem:[#allocation3 + $0x244] ss:$16 sps:$4 sm:$0xff]  }
  0xba   :  { %1334 = vmatpush1.bf16.msra.mxu0 %v1875_v46  ;;  %v1933_v46 = vld [vmem:[#allocation3 + $0x2c4] ss:$16 sps:$4 sm:$0xff]  }
  0xbb   :  { %90 = vadd.xlane.f32.xlu1 %v89_v34  ;;  %v95_v37 = vadd.f32 %v94_v35, %v83_v13  ;;  %1335 = vmatprep.subr.bf16.mxu0 %v1877_v48  ;;  %v1912_v34 = vld [vmem:[#allocation3 + $0x24c] ss:$16 sps:$4 sm:$0xff]   ;;  %v1910_v13 = vld [vmem:[#allocation3 + $0x248] ss:$16 sps:$4 sm:$0xff]   ;;  %v1915_v35 = vld [vmem:[#allocation3 + $0x264] ss:$16 sps:$4 sm:$0xff]  }
  0xbc   :  { %v1931_v48 = vld [vmem:[#allocation3 + $0x2c0] ss:$16 sps:$4 sm:$0xff]  }
  0xbd   :  { %v96_v38 = vadd.f32 %v95_v37, %v84_v36  ;;  %v1918_v36 = vld [vmem:[#allocation3 + $0x26c] ss:$16 sps:$4 sm:$0xff]   ;;  %v1913_v37 = vld [vmem:[#allocation3 + $0x260] ss:$16 sps:$4 sm:$0xff]  }
  0xbe   :  { %1336 = vmatpush1.bf16.msra.mxu0 %v1881_v50  ;;  %v1939_v50 = vld [vmem:[#allocation3 + $0x2e4] ss:$16 sps:$4 sm:$0xff]  }
  0xbf   :  { %97 = vadd.xlane.f32.xlu1 %v96_v38  ;;  %1337 = vmatprep.subr.bf16.mxu0 %v1883_v52  ;;  %v1916_v38 = vld [vmem:[#allocation3 + $0x268] ss:$16 sps:$4 sm:$0xff]   ;;  %v1937_v52 = vld [vmem:[#allocation3 + $0x2e0] ss:$16 sps:$4 sm:$0xff]  }
  0xc2   :  { %1338 = vmatpush1.bf16.msra.mxu0 %v1887_v54  ;;  %v1945_v54 = vld [vmem:[#allocation3 + $0x304] ss:$16 sps:$4 sm:$0xff]  }
  0xc3   :  { %1339 = vmatprep.subr.bf16.mxu0 %v1889_v56  ;;  %v1943_v56 = vld [vmem:[#allocation3 + $0x300] ss:$16 sps:$4 sm:$0xff]  }
  0xc6   :  { %1340 = vmatpush1.bf16.msra.mxu0 %v1893_v58  ;;  %v1951_v58 = vld [vmem:[#allocation3 + $0x324] ss:$16 sps:$4 sm:$0xff]  }
  0xc7   :  { %1352 = vmatprep.subr.bf16.mxu0 %v1897_v60  ;;  %v1949_v60 = vld [vmem:[#allocation3 + $0x320] ss:$16 sps:$4 sm:$0xff]  }
 0x148   :  { %v91_v62 = vpop.xlane.xlu1 %90 }
 0x149   :  { %v99_v63 = vmul.f32 0.0013020834, %v91_v62  ;;  %v1957_v62 = vld [vmem:[#allocation3 + $0x344] ss:$16 sps:$4 sm:$0xff]  }
 0x14b   :  { %v101_v4 = vadd.f32 1e-05, %v99_v63  ;;  %v1960_v63 = vld [vmem:[#allocation3 + $0x34c] ss:$16 sps:$4 sm:$0xff]  }
 0x14c   :  { %v98_v9 = vpop.xlane.xlu1 %97 }
 0x14d   :  { %v100_v17 = vmul.f32 0.0013020834, %v98_v9  ;;  %2087 = vrsqrt.f32 %v101_v4  ;;  %v1955_v4 = vld [vmem:[#allocation3 + $0x340] ss:$16 sps:$4 sm:$0xff]   ;;  %v1958_v9 = vld [vmem:[#allocation3 + $0x348] ss:$16 sps:$4 sm:$0xff]  }
 0x14f   :  { %v102_v19 = vadd.f32 1e-05, %v100_v17  ;;  %v1963_v17 = vld [vmem:[#allocation3 + $0x364] ss:$16 sps:$4 sm:$0xff]  }
 0x151   :  { %2089 = vrsqrt.f32 %v102_v19  ;;  %v1966_v19 = vld [vmem:[#allocation3 + $0x36c] ss:$16 sps:$4 sm:$0xff]  }
 0x157   :  { %v2088_v20 = vpop.eup %2087 }
 0x158   :  { %v106_v1 = vmul.f32 %v2088_v20, %v2226_v14  ;;  %v105_v22 = vmul.f32 %v2088_v20, %v2223_v11  ;;  %v107_v8 = vmul.f32 %v2088_v20, %v2229_v15  ;;  %v110_v7 = vmul.f32 %v2088_v20, %v2253_v24  ;;  %v1895_v11 = vld [vmem:[#allocation3 + $0x200] ss:$16 sps:$4 sm:$0xff]   ;;  %v1903_v24 = vld [vmem:[#allocation3 + $0x224] ss:$16 sps:$4 sm:$0xff]  }
 0x159   :  { %v109_v29 = vmul.f32 %v2088_v20, %v2239_v0 }
 0x15b   :  { %v2090_v21 = vpop.eup %2089 }
 0x15c   :  { %v112_v25 = vmul.f32 %v2090_v21, %v2247_v3  ;;  %v111_v5 = vmul.f32 %v2090_v21, %v2244_v2  ;;  %v113_v6 = vmul.f32 %v2090_v21, %v2250_v23  ;;  %v114_v27 = vmul.f32 %v2090_v21, %v2258_v26  ;;  %v1906_v26 = vld [vmem:[#allocation3 + $0x22c] ss:$16 sps:$4 sm:$0xff]  }
 0x15d   :  { %v116_v28 = vmul.f32 %v2090_v21, %v2274_v31  ;;  %v115_v14 = vmul.f32 %v2090_v21, %v2267_v12  ;;  %v108_v2 = vmul.f32 %v2088_v20, %v2232_v18  ;;  %v1901_v12 = vld [vmem:[#allocation3 + $0x220] ss:$16 sps:$4 sm:$0xff]   ;;  %v1904_v31 = vld [vmem:[#allocation3 + $0x228] ss:$16 sps:$4 sm:$0xff]  }
 0x15e   :  { %v118_v10 = vpack.c.bf16 %v112_v25, %v106_v1  ;;  %v117_v15 = vpack.c.bf16 %v111_v5, %v105_v22  ;;  %v2293_v32 = vpack.c.bf16 %v113_v6, %v107_v8  ;;  %v1907_v18 = vld [vmem:[#allocation3 + $0x240] ss:$16 sps:$4 sm:$0xff]   ;;  %v1964_v21 = vld [vmem:[#allocation3 + $0x368] ss:$16 sps:$4 sm:$0xff]   ;;  %v1969_v1 = vld [vmem:[#allocation3 + $0x384] ss:$16 sps:$4 sm:$0xff]  }
 0x15f   :  { %v2296_v3 = vpack.c.bf16 %v116_v28, %v110_v7  ;;  %v2298_v23 = vpack.c.bf16 %v115_v14, %v109_v29  ;;  %v120_v0 = vpack.c.bf16 %v114_v27, %v108_v2  ;;  %v1961_v20 = vld [vmem:[#allocation3 + $0x360] ss:$16 sps:$4 sm:$0xff]   ;;  %v1972_v22 = vld [vmem:[#allocation3 + $0x38c] ss:$16 sps:$4 sm:$0xff]   ;;  %v1970_v25 = vld [vmem:[#allocation3 + $0x388] ss:$16 sps:$4 sm:$0xff]  }
 0x160   :  { %1341 = vmatprep.mubr.bf16.mxu0 %v118_v10  ;;  %1470 = vmatprep.mubr.bf16.mxu1 %v118_v10  ;;  %v1967_v8 = vld [vmem:[#allocation3 + $0x380] ss:$16 sps:$4 sm:$0xff]   ;;  %v1975_v5 = vld [vmem:[#allocation3 + $0x3a4] ss:$16 sps:$4 sm:$0xff]   ;;  %v1978_v6 = vld [vmem:[#allocation3 + $0x3ac] ss:$16 sps:$4 sm:$0xff]  }
 0x161   :  { %1342 = vmatmul.mubr.bf16.vlgmr.msra.gmra.mrb[0].mxu0 %v117_v15  ;;  %1471 = vmatmul.mubr.bf16.vlgmr.msra.gmra.mrb[0].mxu1 %v117_v15  ;;  %v1973_v7 = vld [vmem:[#allocation3 + $0x3a0] ss:$16 sps:$4 sm:$0xff]   ;;  %v1976_v27 = vld [vmem:[#allocation3 + $0x3a8] ss:$16 sps:$4 sm:$0xff]   ;;  %v1981_v28 = vld [vmem:[#allocation3 + $0x3c4] ss:$16 sps:$4 sm:$0xff]  }
 0x162   :  { %1353 = vmatpush1.bf16.msra.mxu0 %v1895_v11  ;;  %1482 = vmatpush1.bf16.msra.mxu1 %v1898_v30  ;;  %v1984_v29 = vld [vmem:[#allocation3 + $0x3cc] ss:$16 sps:$4 sm:$0xff]   ;;  %v1979_v14 = vld [vmem:[#allocation3 + $0x3c0] ss:$16 sps:$4 sm:$0xff]   ;;  %v1982_v10 = vld [vmem:[#allocation3 + $0x3c8] ss:$16 sps:$4 sm:$0xff]  }
 0x163   :  { %1384 = vmatprep.mubr.bf16.mxu0 %v120_v0  ;;  %1513 = vmatprep.mubr.bf16.mxu1 %v120_v0  ;;  %v1987_v11 = vld [vmem:[#allocation3 + $0x3e4] ss:$16 sps:$4 sm:$0xff]   ;;  %v1990_v30 = vld [vmem:[#allocation3 + $0x3ec] ss:$16 sps:$4 sm:$0xff]   ;;  %v1985_v15 = vld [vmem:[#allocation3 + $0x3e0] ss:$16 sps:$4 sm:$0xff]  }
 0x164   :  { %1354 = vmatprep.subr.bf16.mxu0 %v1903_v24  ;;  %1483 = vmatprep.subr.bf16.mxu1 %v1906_v26  ;;  %v1988_v2 = vld [vmem:[#allocation3 + $0x3e8] ss:$16 sps:$4 sm:$0xff]   ;;  %v1993_v24 = vld [vmem:[#allocation3 + $0x404] ss:$16 sps:$4 sm:$0xff]   ;;  %v1996_v26 = vld [vmem:[#allocation3 + $0x40c] ss:$16 sps:$4 sm:$0xff]  }
 0x165   :  { %v1991_v0 = vld [vmem:[#allocation3 + $0x400] ss:$16 sps:$4 sm:$0xff]  }
 0x166   :  { %1355 = vmatpush1.bf16.msra.mxu0 %v1901_v12  ;;  %1484 = vmatpush1.bf16.msra.mxu1 %v1904_v31  ;;  %v1994_v12 = vld [vmem:[#allocation3 + $0x408] ss:$16 sps:$4 sm:$0xff]   ;;  %v1999_v31 = vld [vmem:[#allocation3 + $0x424] ss:$16 sps:$4 sm:$0xff]  }
 0x167   :  { %1356 = vmatprep.subr.bf16.mxu0 %v1909_v33  ;;  %1485 = vmatprep.subr.bf16.mxu1 %v1912_v34  ;;  %v2002_v33 = vld [vmem:[#allocation3 + $0x42c] ss:$16 sps:$4 sm:$0xff]   ;;  %v1997_v34 = vld [vmem:[#allocation3 + $0x420] ss:$16 sps:$4 sm:$0xff]  }
 0x16a   :  { %1357 = vmatpush1.bf16.msra.mxu0 %v1907_v18  ;;  %1486 = vmatpush1.bf16.msra.mxu1 %v1910_v13  ;;  %v2000_v18 = vld [vmem:[#allocation3 + $0x428] ss:$16 sps:$4 sm:$0xff]   ;;  %v2005_v13 = vld [vmem:[#allocation3 + $0x444] ss:$16 sps:$4 sm:$0xff]  }
 0x16b   :  { %1358 = vmatprep.subr.bf16.mxu0 %v1915_v35  ;;  %1487 = vmatprep.subr.bf16.mxu1 %v1918_v36  ;;  %v2008_v35 = vld [vmem:[#allocation3 + $0x44c] ss:$16 sps:$4 sm:$0xff]   ;;  %v2003_v36 = vld [vmem:[#allocation3 + $0x440] ss:$16 sps:$4 sm:$0xff]  }
 0x16e   :  { %1359 = vmatpush1.bf16.msra.mxu0 %v1913_v37  ;;  %1488 = vmatpush1.bf16.msra.mxu1 %v1916_v38  ;;  %v2006_v37 = vld [vmem:[#allocation3 + $0x448] ss:$16 sps:$4 sm:$0xff]   ;;  %v2011_v38 = vld [vmem:[#allocation3 + $0x464] ss:$16 sps:$4 sm:$0xff]  }
 0x16f   :  { %1360 = vmatprep.subr.bf16.mxu0 %v1921_v39  ;;  %1489 = vmatprep.subr.bf16.mxu1 %v1924_v40  ;;  %v2009_v39 = vld [vmem:[#allocation3 + $0x460] ss:$16 sps:$4 sm:$0xff]   ;;  %v2012_v40 = vld [vmem:[#allocation3 + $0x468] ss:$16 sps:$4 sm:$0xff]  }
 0x172   :  { %1361 = vmatpush1.bf16.msra.mxu0 %v1919_v16  ;;  %1490 = vmatpush1.bf16.msra.mxu1 %v1922_v41  ;;  %v2017_v16 = vld [vmem:[#allocation3 + $0x484] ss:$16 sps:$4 sm:$0xff]   ;;  %v2015_v41 = vld [vmem:[#allocation3 + $0x480] ss:$16 sps:$4 sm:$0xff]  }
 0x173   :  { %1362 = vmatprep.subr.bf16.mxu0 %v1927_v42  ;;  %1491 = vmatprep.subr.bf16.mxu1 %v1930_v43  ;;  %v2018_v42 = vld [vmem:[#allocation3 + $0x488] ss:$16 sps:$4 sm:$0xff]   ;;  %v2023_v43 = vld [vmem:[#allocation3 + $0x4a4] ss:$16 sps:$4 sm:$0xff]  }
 0x176   :  { %1363 = vmatpush1.bf16.msra.mxu0 %v1925_v44  ;;  %1492 = vmatpush1.bf16.msra.mxu1 %v1928_v45  ;;  %v2026_v44 = vld [vmem:[#allocation3 + $0x4ac] ss:$16 sps:$4 sm:$0xff]   ;;  %v2021_v45 = vld [vmem:[#allocation3 + $0x4a0] ss:$16 sps:$4 sm:$0xff]  }
 0x177   :  { %1364 = vmatprep.subr.bf16.mxu0 %v1933_v46  ;;  %1493 = vmatprep.subr.bf16.mxu1 %v1936_v47  ;;  %v2024_v46 = vld [vmem:[#allocation3 + $0x4a8] ss:$16 sps:$4 sm:$0xff]   ;;  %v2029_v47 = vld [vmem:[#allocation3 + $0x4c4] ss:$16 sps:$4 sm:$0xff]  }
 0x17a   :  { %1365 = vmatpush1.bf16.msra.mxu0 %v1931_v48  ;;  %1494 = vmatpush1.bf16.msra.mxu1 %v1934_v49  ;;  %v2032_v48 = vld [vmem:[#allocation3 + $0x4cc] ss:$16 sps:$4 sm:$0xff]   ;;  %v2027_v49 = vld [vmem:[#allocation3 + $0x4c0] ss:$16 sps:$4 sm:$0xff]  }
 0x17b   :  { %1366 = vmatprep.subr.bf16.mxu0 %v1939_v50  ;;  %1495 = vmatprep.subr.bf16.mxu1 %v1942_v51  ;;  %v2030_v50 = vld [vmem:[#allocation3 + $0x4c8] ss:$16 sps:$4 sm:$0xff]   ;;  %v2035_v51 = vld [vmem:[#allocation3 + $0x4e4] ss:$16 sps:$4 sm:$0xff]  }
 0x17e   :  { %1367 = vmatpush1.bf16.msra.mxu0 %v1937_v52  ;;  %1496 = vmatpush1.bf16.msra.mxu1 %v1940_v53  ;;  %v2038_v52 = vld [vmem:[#allocation3 + $0x4ec] ss:$16 sps:$4 sm:$0xff]   ;;  %v2033_v53 = vld [vmem:[#allocation3 + $0x4e0] ss:$16 sps:$4 sm:$0xff]  }
 0x17f   :  { %1368 = vmatprep.subr.bf16.mxu0 %v1945_v54  ;;  %1497 = vmatprep.subr.bf16.mxu1 %v1948_v55  ;;  %v2036_v54 = vld [vmem:[#allocation3 + $0x4e8] ss:$16 sps:$4 sm:$0xff]   ;;  %v2041_v55 = vld [vmem:[#allocation3 + $0x504] ss:$16 sps:$4 sm:$0xff]  }
 0x182   :  { %1369 = vmatpush1.bf16.msra.mxu0 %v1943_v56  ;;  %1498 = vmatpush1.bf16.msra.mxu1 %v1946_v57  ;;  %v2044_v56 = vld [vmem:[#allocation3 + $0x50c] ss:$16 sps:$4 sm:$0xff]   ;;  %v2039_v57 = vld [vmem:[#allocation3 + $0x500] ss:$16 sps:$4 sm:$0xff]  }
 0x183   :  { %1370 = vmatprep.subr.bf16.mxu0 %v1951_v58  ;;  %1499 = vmatprep.subr.bf16.mxu1 %v1954_v59  ;;  %v2042_v58 = vld [vmem:[#allocation3 + $0x508] ss:$16 sps:$4 sm:$0xff]   ;;  %v2047_v59 = vld [vmem:[#allocation3 + $0x524] ss:$16 sps:$4 sm:$0xff]  }
 0x186   :  { %1371 = vmatpush1.bf16.msra.mxu0 %v1949_v60  ;;  %1500 = vmatpush1.bf16.msra.mxu1 %v1952_v61  ;;  %v2050_v60 = vld [vmem:[#allocation3 + $0x52c] ss:$16 sps:$4 sm:$0xff]   ;;  %v2045_v61 = vld [vmem:[#allocation3 + $0x520] ss:$16 sps:$4 sm:$0xff]  }
 0x187   :  { %1372 = vmatprep.subr.bf16.mxu0 %v1957_v62  ;;  %1501 = vmatprep.subr.bf16.mxu1 %v1960_v63  ;;  %v2048_v62 = vld [vmem:[#allocation3 + $0x528] ss:$16 sps:$4 sm:$0xff]   ;;  %v2053_v63 = vld [vmem:[#allocation3 + $0x544] ss:$16 sps:$4 sm:$0xff]  }
 0x18a   :  { %1373 = vmatpush1.bf16.msra.mxu0 %v1955_v4  ;;  %1502 = vmatpush1.bf16.msra.mxu1 %v1958_v9  ;;  %v2056_v4 = vld [vmem:[#allocation3 + $0x54c] ss:$16 sps:$4 sm:$0xff]   ;;  %v2051_v9 = vld [vmem:[#allocation3 + $0x540] ss:$16 sps:$4 sm:$0xff]  }
 0x18b   :  { %1374 = vmatprep.subr.bf16.mxu0 %v1963_v17  ;;  %1503 = vmatprep.subr.bf16.mxu1 %v1966_v19  ;;  %v2054_v17 = vld [vmem:[#allocation3 + $0x548] ss:$16 sps:$4 sm:$0xff]   ;;  %v2059_v19 = vld [vmem:[#allocation3 + $0x564] ss:$16 sps:$4 sm:$0xff]  }
 0x18e   :  { %1375 = vmatpush1.bf16.msra.mxu0 %v1961_v20  ;;  %1504 = vmatpush1.bf16.msra.mxu1 %v1964_v21  ;;  %v2062_v20 = vld [vmem:[#allocation3 + $0x56c] ss:$16 sps:$4 sm:$0xff]   ;;  %v2057_v21 = vld [vmem:[#allocation3 + $0x560] ss:$16 sps:$4 sm:$0xff]  }
 0x18f   :  { %1376 = vmatprep.subr.bf16.mxu0 %v1969_v1  ;;  %1505 = vmatprep.subr.bf16.mxu1 %v1972_v22  ;;  %v2060_v1 = vld [vmem:[#allocation3 + $0x568] ss:$16 sps:$4 sm:$0xff]   ;;  %v2065_v22 = vld [vmem:[#allocation3 + $0x584] ss:$16 sps:$4 sm:$0xff]  }
 0x192   :  { %1377 = vmatpush1.bf16.msra.mxu0 %v1967_v8  ;;  %1506 = vmatpush1.bf16.msra.mxu1 %v1970_v25  ;;  %v2068_v8 = vld [vmem:[#allocation3 + $0x58c] ss:$16 sps:$4 sm:$0xff]   ;;  %v2063_v25 = vld [vmem:[#allocation3 + $0x580] ss:$16 sps:$4 sm:$0xff]  }
 0x193   :  { %1378 = vmatprep.subr.bf16.mxu0 %v1975_v5  ;;  %1507 = vmatprep.subr.bf16.mxu1 %v1978_v6  ;;  %v2066_v5 = vld [vmem:[#allocation3 + $0x588] ss:$16 sps:$4 sm:$0xff]   ;;  %v2071_v6 = vld [vmem:[#allocation3 + $0x5a4] ss:$16 sps:$4 sm:$0xff]  }
 0x196   :  { %1379 = vmatpush1.bf16.msra.mxu0 %v1973_v7  ;;  %1508 = vmatpush1.bf16.msra.mxu1 %v1976_v27  ;;  %v2074_v7 = vld [vmem:[#allocation3 + $0x5ac] ss:$16 sps:$4 sm:$0xff]   ;;  %v2069_v27 = vld [vmem:[#allocation3 + $0x5a0] ss:$16 sps:$4 sm:$0xff]  }
 0x197   :  { %1380 = vmatprep.subr.bf16.mxu0 %v1981_v28  ;;  %1509 = vmatprep.subr.bf16.mxu1 %v1984_v29  ;;  %v2072_v28 = vld [vmem:[#allocation3 + $0x5a8] ss:$16 sps:$4 sm:$0xff]   ;;  %v2077_v29 = vld [vmem:[#allocation3 + $0x5c4] ss:$16 sps:$4 sm:$0xff]  }
 0x19a   :  { %1381 = vmatpush1.bf16.msra.mxu0 %v1979_v14  ;;  %1510 = vmatpush1.bf16.msra.mxu1 %v1982_v10  ;;  %v2080_v14 = vld [vmem:[#allocation3 + $0x5cc] ss:$16 sps:$4 sm:$0xff]   ;;  %v2075_v10 = vld [vmem:[#allocation3 + $0x5c0] ss:$16 sps:$4 sm:$0xff]  }
 0x19b   :  { %1382 = vmatprep.subr.bf16.mxu0 %v1987_v11  ;;  %1511 = vmatprep.subr.bf16.mxu1 %v1990_v30  ;;  %v2078_v11 = vld [vmem:[#allocation3 + $0x5c8] ss:$16 sps:$4 sm:$0xff]   ;;  %v2083_v30 = vld [vmem:[#allocation3 + $0x5e4] ss:$16 sps:$4 sm:$0xff]  }
 0x19e   :  { %1383 = vmatpush1.bf16.msra.mxu0 %v1985_v15  ;;  %1512 = vmatpush1.bf16.msra.mxu1 %v1988_v2  ;;  %v2086_v15 = vld [vmem:[#allocation3 + $0x5ec] ss:$16 sps:$4 sm:$0xff]   ;;  %v2081_v2 = vld [vmem:[#allocation3 + $0x5e0] ss:$16 sps:$4 sm:$0xff]  }
 0x19f   :  { %1395 = vmatprep.subr.bf16.mxu0 %v1993_v24  ;;  %1524 = vmatprep.subr.bf16.mxu1 %v1996_v26  ;;  %v2084_v24 = vld [vmem:[#allocation3 + $0x5e8] ss:$16 sps:$4 sm:$0xff]   ;;  %v329_v26 = vlaneseq }
 0x1a1   :  { %1385 = vmatmul.mubr.bf16.vlgmr.msra.gmra.mrb[0].mxu0 %v2293_v32  ;;  %1514 = vmatmul.mubr.bf16.vlgmr.msra.gmra.mrb[0].mxu1 %v2293_v32  ;;  %v2014_v32 = vld [vmem:[#allocation3 + $0x46c] ss:$16 sps:$4 sm:$0xff]  }
 0x1a2   :  { %1396 = vmatpush1.bf16.msra.mxu0 %v1991_v0  ;;  %1427 = vmatprep.mubr.bf16.mxu0 %v2296_v3  ;;  %v330_v0 = vshrl.u32 %v329_v26, 7 }
 0x1a3   :  { %1525 = vmatpush1.bf16.msra.mxu1 %v1994_v12  ;;  %1556 = vmatprep.mubr.bf16.mxu1 %v2296_v3  ;;  %v2020_v3 = vld [vmem:[#allocation3 + $0x48c] ss:$16 sps:$4 sm:$0xff]  }
 0x1a4   :  { %1397 = vmatprep.subr.bf16.mxu0 %v1999_v31  ;;  %1526 = vmatprep.subr.bf16.mxu1 %v2002_v33  ;;  %v331_v12 = vsub.s32 0, %v330_v0  ;;  %v327_v31 = vld [vmem:[%s2335_s2] sm:$0xf]  ;;  %v339_v33 = vsub.s32 2, %v330_v0 }
 0x1a6   :  { %1398 = vmatpush1.bf16.msra.mxu0 %v1997_v34  ;;  %v335_v34 = vsub.s32 1, %v330_v0 }
 0x1a7   :  { %1527 = vmatpush1.bf16.msra.mxu1 %v2000_v18  ;;  %1399 = vmatprep.subr.bf16.mxu0 %v2005_v13  ;;  %v343_v18 = vsub.s32 3, %v330_v0  ;;  %v332_v13 = vrot.slane %v327_v31, %v331_v12 }
 0x1a8   :  { %1528 = vmatprep.subr.bf16.mxu1 %v2008_v35  ;;  %v340_v35 = vrot.slane %v327_v31, %v339_v33 }
 0x1aa   :  { %1400 = vmatpush1.bf16.msra.mxu0 %v2003_v36  ;;  %v336_v36 = vrot.slane %v327_v31, %v335_v34 }
 0x1ab   :  { %1529 = vmatpush1.bf16.msra.mxu1 %v2006_v37  ;;  %1401 = vmatprep.subr.bf16.mxu0 %v2011_v38  ;;  %v344_v37 = vrot.slane %v327_v31, %v343_v18 }
 0x1ac   :  { %1530 = vmatprep.subr.bf16.mxu1 %v2014_v32 }
 0x1ae   :  { %1402 = vmatpush1.bf16.msra.mxu0 %v2009_v39 }
 0x1af   :  { %1531 = vmatpush1.bf16.msra.mxu1 %v2012_v40  ;;  %1403 = vmatprep.subr.bf16.mxu0 %v2017_v16 }
 0x1b0   :  { %1532 = vmatprep.subr.bf16.mxu1 %v2020_v3 }
 0x1b2   :  { %1404 = vmatpush1.bf16.msra.mxu0 %v2015_v41 }
 0x1b3   :  { %1533 = vmatpush1.bf16.msra.mxu1 %v2018_v42  ;;  %1405 = vmatprep.subr.bf16.mxu0 %v2023_v43 }
 0x1b4   :  { %1534 = vmatprep.subr.bf16.mxu1 %v2026_v44 }
 0x1b6   :  { %1406 = vmatpush1.bf16.msra.mxu0 %v2021_v45 }
 0x1b7   :  { %1535 = vmatpush1.bf16.msra.mxu1 %v2024_v46  ;;  %1407 = vmatprep.subr.bf16.mxu0 %v2029_v47 }
 0x1b8   :  { %1536 = vmatprep.subr.bf16.mxu1 %v2032_v48 }
 0x1ba   :  { %1408 = vmatpush1.bf16.msra.mxu0 %v2027_v49 }
 0x1bb   :  { %1537 = vmatpush1.bf16.msra.mxu1 %v2030_v50  ;;  %1409 = vmatprep.subr.bf16.mxu0 %v2035_v51 }
 0x1bc   :  { %1538 = vmatprep.subr.bf16.mxu1 %v2038_v52 }
 0x1be   :  { %1410 = vmatpush1.bf16.msra.mxu0 %v2033_v53 }
 0x1bf   :  { %1539 = vmatpush1.bf16.msra.mxu1 %v2036_v54  ;;  %1411 = vmatprep.subr.bf16.mxu0 %v2041_v55 }
 0x1c0   :  { %1540 = vmatprep.subr.bf16.mxu1 %v2044_v56 }
 0x1c2   :  { %1412 = vmatpush1.bf16.msra.mxu0 %v2039_v57 }
 0x1c3   :  { %1541 = vmatpush1.bf16.msra.mxu1 %v2042_v58  ;;  %1413 = vmatprep.subr.bf16.mxu0 %v2047_v59 }
 0x1c4   :  { %1542 = vmatprep.subr.bf16.mxu1 %v2050_v60 }
 0x1c6   :  { %1414 = vmatpush1.bf16.msra.mxu0 %v2045_v61 }
 0x1c7   :  { %1543 = vmatpush1.bf16.msra.mxu1 %v2048_v62  ;;  %1415 = vmatprep.subr.bf16.mxu0 %v2053_v63 }
 0x1c8   :  { %1544 = vmatprep.subr.bf16.mxu1 %v2056_v4 }
 0x1ca   :  { %1416 = vmatpush1.bf16.msra.mxu0 %v2051_v9 }
 0x1cb   :  { %1545 = vmatpush1.bf16.msra.mxu1 %v2054_v17  ;;  %1417 = vmatprep.subr.bf16.mxu0 %v2059_v19 }
 0x1cc   :  { %1546 = vmatprep.subr.bf16.mxu1 %v2062_v20 }
 0x1ce   :  { %1418 = vmatpush1.bf16.msra.mxu0 %v2057_v21 }
 0x1cf   :  { %1547 = vmatpush1.bf16.msra.mxu1 %v2060_v1  ;;  %1419 = vmatprep.subr.bf16.mxu0 %v2065_v22 }
 0x1d0   :  { %1548 = vmatprep.subr.bf16.mxu1 %v2068_v8 }
 0x1d2   :  { %1420 = vmatpush1.bf16.msra.mxu0 %v2063_v25 }
 0x1d3   :  { %1549 = vmatpush1.bf16.msra.mxu1 %v2066_v5  ;;  %1421 = vmatprep.subr.bf16.mxu0 %v2071_v6 }
 0x1d4   :  { %1550 = vmatprep.subr.bf16.mxu1 %v2074_v7 }
 0x1d6   :  { %1422 = vmatpush1.bf16.msra.mxu0 %v2069_v27 }
 0x1d7   :  { %1551 = vmatpush1.bf16.msra.mxu1 %v2072_v28  ;;  %1423 = vmatprep.subr.bf16.mxu0 %v2077_v29 }
 0x1d8   :  { %1552 = vmatprep.subr.bf16.mxu1 %v2080_v14 }
 0x1da   :  { %1424 = vmatpush1.bf16.msra.mxu0 %v2075_v10 }
 0x1db   :  { %1553 = vmatpush1.bf16.msra.mxu1 %v2078_v11  ;;  %1425 = vmatprep.subr.bf16.mxu0 %v2083_v30 }
 0x1dc   :  { %1554 = vmatprep.subr.bf16.mxu1 %v2086_v15 }
 0x1de   :  { %1426 = vmatpush1.bf16.msra.mxu0 %v2081_v2 }
 0x1df   :  { %1555 = vmatpush1.bf16.msra.mxu1 %v2084_v24 }
 0x1e1   :  { %1428 = vmatmul.mubr.bf16.vlgmr.msra.gmra.mrb[0].mxu0 %v2298_v23 }
 0x1e2   :  { %1557 = vmatmul.mubr.bf16.vlgmr.msra.gmra.mrb[0].mxu1 %v2298_v23 }
 0x2b4   :  { %v1429_v38 = vpop.f32.mrb[0].mxu0 }
 0x2b5   :  { %v1772_v32 = vadd.f32 %v1429_v38, %v332_v13  ;;  %v1558_v39 = vpop.f32.mrb[0].mxu1  ;;  %v1431_v40 = vpop.f32.mrb[1].mxu0 }
 0x2b6   :  { %v1776_v16 = vadd.f32 %v1558_v39, %v340_v35  ;;  %v1773_v23 = vadd.f32 %v1431_v40, %v336_v36  ;;  %v1560_v3 = vpop.f32.mrb[1].mxu1  ;;  %v1433_v41 = vpop.f32.mrb[2].mxu0 }
 0x2b7   :  { %1567 = vst [vmem:[%s2336_s3] sm:$0xff] %v1772_v32  ;;  %v1777_v42 = vadd.f32 %v1560_v3, %v344_v37  ;;  %v1774_v43 = vadd.f32 %v1433_v41, %v332_v13  ;;  %v1562_v44 = vpop.f32.mrb[2].mxu1  ;;  %v1435_v45 = vpop.f32.mrb[3].mxu0 }
 0x2b8   :  { %1569 = vst [vmem:[%s2336_s3 + $0x10] sm:$0xff] %v1776_v16  ;;  %1568 = vst [vmem:[%s2336_s3 + $0x8] sm:$0xff] %v1773_v23  ;;  %v1778_v46 = vadd.f32 %v1562_v44, %v340_v35  ;;  %v1775_v47 = vadd.f32 %v1435_v45, %v336_v36  ;;  %v1564_v48 = vpop.f32.mrb[3].mxu1 }
 0x2b9   :  { %1570 = vst [vmem:[%s2336_s3 + $0x18] sm:$0xff] %v1777_v42  ;;  %1571 = vst [vmem:[%s2336_s3 + $0x20] sm:$0xff] %v1774_v43  ;;  %v1779_v49 = vadd.f32 %v1564_v48, %v344_v37 }
 0x2ba   :  { %1573 = vst [vmem:[%s2336_s3 + $0x30] sm:$0xff] %v1778_v46  ;;  %1572 = vst [vmem:[%s2336_s3 + $0x28] sm:$0xff] %v1775_v47 }
 0x2bb   :  { %1574 = vst [vmem:[%s2336_s3 + $0x38] sm:$0xff] %v1779_v49 }
 0x2bc   :  { %1579 = vsyncpa [#allocation4], 1 }

</bundles_post_ra>
